<compile_context>
chip_gen: v5e
topology: v5e:2x2
jax: 0.10.0
libtpu: 0.0.40
codegen_flags: <defaults>
</compile_context>

<pallas_src>
import functools

import jax
import jax.numpy as jnp
from jax.experimental import pallas as pl
from jax.experimental.pallas import tpu as pltpu

NUM_LAYERS = 7      # [in, 64, 64, 64, 64, 64, 64, state_size] -> 7 Linear layers
PAD = 128           # lane-dense feature width used for every layer inside the kernel
EMB_ROWS = 8        # one-hot / folded-embedding sublane width (3 real rows, padded to 8)


# ----------------------------------------------------------------------------
# Kernel
# ----------------------------------------------------------------------------
def mlp_kernel(x_ref, mode_ref, embw_ref, w_ref, b_ref, out_ref):
    """Fused (embedding-folded) 7-layer MLP.

    x_ref    : (B, 128)       f32  lane-dense input; real data in lanes [0:Xw], rest zero
    mode_ref : (B, 1)         i32  mode indices in [0, 3)
    embw_ref : (8, 128)       f32  folded embedding: rows [0:3] hold emb @ W0[Xw:Xw+5]
    w_ref    : (7, 128, 128)  f32  zero-padded layer weights, (in_features, out_features);
                                   layer 0 holds only the x-rows of W0 (embedding rows folded)
    b_ref    : (7, B, 128)    f32  pre-broadcast, zero-padded layer biases
    out_ref  : (B, 128)       f32  lane-dense output; columns [state_size:] are exactly zero
    """
    B = x_ref.shape[0]

    mode = mode_ref[...]                                        # (B, 1) int32
    hot = (jax.lax.broadcasted_iota(jnp.int32, (B, EMB_ROWS), 1)
           == mode).astype(jnp.float32)                         # (B, 8) one-hot

    # Layer 0: two independent MXU dots (x part + folded-embedding part) + bias.
    h = (jnp.dot(x_ref[...], w_ref[0], preferred_element_type=jnp.float32)
         + jnp.dot(hot, embw_ref[...], preferred_element_type=jnp.float32)
         + b_ref[0])
    h = jnp.tanh(h)

    for i in range(1, NUM_LAYERS):                              # fully unrolled
        h = jnp.dot(h, w_ref[i], preferred_element_type=jnp.float32) + b_ref[i]
        if i < NUM_LAYERS - 1:
            h = jnp.tanh(h)

    out_ref[...] = h                                            # lane-dense (B, 128) store


# ----------------------------------------------------------------------------
# Wrapper
# ----------------------------------------------------------------------------
def _vmem_spec():
    return pl.BlockSpec(memory_space=pltpu.MemorySpace.VMEM)


@functools.partial(jax.jit, static_argnames=("state_size",))
def embedded_custom_network(x, mode, packed, *, state_size):
    """JAX wrapper reproducing EmbeddedCustomNetwork.forward(x, mode)."""
    B, x_width = x.shape
    assert x_width <= PAD

    # Layout plumbing only (lane-dense input, pre-broadcast bias); no compute hoisted.
    x_pad = jnp.pad(x.astype(jnp.float32), ((0, 0), (0, PAD - x_width)))
    mode2d = mode.reshape(B, 1).astype(jnp.int32)
    b_bcast = jnp.broadcast_to(packed["b"][:, None, :], (NUM_LAYERS, B, PAD))

    flops = 2 * B * PAD * PAD * NUM_LAYERS + 2 * B * EMB_ROWS * PAD
    transcendentals = (NUM_LAYERS - 1) * B * PAD
    bytes_accessed = 4 * (NUM_LAYERS * PAD * PAD          # weights
                          + EMB_ROWS * PAD                 # folded embedding
                          + NUM_LAYERS * B * PAD           # biases
                          + 2 * B * PAD + B)               # x in, out, mode

    out = pl.pallas_call(
        mlp_kernel,
        out_shape=jax.ShapeDtypeStruct((B, PAD), jnp.float32),
        in_specs=[_vmem_spec() for _ in range(5)],
        out_specs=_vmem_spec(),
        cost_estimate=pl.CostEstimate(flops=flops,
                                      transcendentals=transcendentals,
                                      bytes_accessed=bytes_accessed),
    )(x_pad, mode2d, packed["embw"], packed["w"], b_bcast)

    return out[:, :state_size]


# ----------------------------------------------------------------------------
# Parameter init (matches the PyTorch module) and one-time packing
# ----------------------------------------------------------------------------
def init_params(key, input_size, state_size):
    """nn.Embedding(3,5): N(0,1); nn.Linear: xavier_uniform_ weights, zero bias.
    Weights stored transposed vs PyTorch, i.e. (in_features, out_features)."""
    x_width = input_size + state_size
    layer_sizes = [x_width + 5] + [64] * 6 + [state_size]
    keys = jax.random.split(key, NUM_LAYERS + 1)

    embedding = jax.random.normal(keys[0], (3, 5), jnp.float32)

    weights, biases = [], []
    for i in range(NUM_LAYERS):
        fan_in, fan_out = layer_sizes[i], layer_sizes[i + 1]
        limit = (6.0 / (fan_in + fan_out)) ** 0.5
        w = jax.random.uniform(keys[i + 1], (fan_in, fan_out),
                               jnp.float32, minval=-limit, maxval=limit)
        weights.append(w)
        biases.append(jnp.zeros((fan_out,), jnp.float32))

    return {"embedding": embedding, "weights": weights, "biases": biases}


def pack_params(params, input_size, state_size):
    """One-time packing into lane-dense, zero-padded buffers (outside the hot path).

    Layer 0 is split at pack time:
      * rows [0:x_width] of W0 (the raw-x part) go into w_all[0],
      * the embedding part is pre-multiplied: embw[:3] = emb @ W0[x_width:x_width+5],
        so the kernel only needs `onehot(mode) @ embw`.
    Padding is kept exactly zero so output columns >= state_size stay exactly zero.
    """
    x_width = input_size + state_size
    emb = params["embedding"]            # (3, 5)
    ws, bs = params["weights"], params["biases"]

    w_all = jnp.zeros((NUM_LAYERS, PAD, PAD), jnp.float32)

    w0 = ws[0]                                           # (x_width + 5, 64)
    w_all = w_all.at[0, :x_width, :w0.shape[1]].set(w0[:x_width])
    embw = jnp.zeros((EMB_ROWS, PAD), jnp.float32)
    embw = embw.at[:3, :w0.shape[1]].set(emb @ w0[x_width:x_width + 5])

    for i in range(1, NUM_LAYERS):
        w = ws[i]
        w_all = w_all.at[i, :w.shape[0], :w.shape[1]].set(w)

    b_all = jnp.zeros((NUM_LAYERS, PAD), jnp.float32)
    for i, b in enumerate(bs):
        b_all = b_all.at[i, :b.shape[0]].set(b)

    return {"embw": embw, "w": w_all, "b": b_all}


# ----------------------------------------------------------------------------
# Pure-JAX reference (unpadded) for correctness check
# ----------------------------------------------------------------------------
def reference_forward(x, mode, params):
    emb = jnp.take(params["embedding"], mode, axis=0)
    h = jnp.concatenate([x, emb], axis=-1)
    for i in range(NUM_LAYERS):
        h = h @ params["weights"][i] + params["biases"][i]
        if i < NUM_LAYERS - 1:
            h = jnp.tanh(h)
    return h


if __name__ == "__main__":
    input_size = 12
    state_size = 8
    batch = 8

    key = jax.random.PRNGKey(0)
    k_params, k_x, k_mode = jax.random.split(key, 3)

    params = init_params(k_params, input_size, state_size)
    packed = pack_params(params, input_size, state_size)

    # forward() expects x of width input_size + state_size (state concatenated in)
    x = jax.random.normal(k_x, (batch, input_size + state_size), jnp.float32)
    mode = jax.random.randint(k_mode, (batch,), 0, 3, dtype=jnp.int32)

    out = embedded_custom_network(x, mode, packed, state_size=state_size)
    out = jax.block_until_ready(out)

    ref = reference_forward(x, mode, params)
    assert out.shape == (batch, state_size)
    assert jnp.allclose(out, ref, atol=1e-4, rtol=1e-4), \
        float(jnp.max(jnp.abs(out - ref)))

    print("KERNEL_OK")
</pallas_src>

<mosaic_0001>
module attributes {stable_mosaic.version = 11 : i64} {
  func.func @mlp_kernel(%arg0: memref<8x128xf32, #tpu.memory_space<vmem>>, %arg1: memref<8x1xi32, #tpu.memory_space<vmem>>, %arg2: memref<8x128xf32, #tpu.memory_space<vmem>>, %arg3: memref<7x128x128xf32, #tpu.memory_space<vmem>>, %arg4: memref<7x8x128xf32, #tpu.memory_space<vmem>>, %arg5: memref<8x128xf32, #tpu.memory_space<vmem>>) attributes {dimension_semantics = [], scalar_prefetch = 0 : i64, scratch_operands = 0 : i64, tpu.core_type = #tpu.core_type<tc>} {
    %c0 = arith.constant 0 : index
    %c0_0 = arith.constant 0 : index
    %0 = vector.load %arg1[%c0, %c0_0] : memref<8x1xi32, #tpu.memory_space<vmem>>, vector<8x1xi32>
    %1 = tpu.iota {dimensions = array<i32: 1>} : vector<8x8xi32>
    %2 = vector.broadcast %0 : vector<8x1xi32> to vector<8x8xi32>
    %3 = arith.cmpi eq, %1, %2 : vector<8x8xi32>
    %4 = arith.extui %3 : vector<8x8xi1> to vector<8x8xi32>
    %5 = arith.sitofp %4 : vector<8x8xi32> to vector<8x8xf32>
    %c0_1 = arith.constant 0 : index
    %c0_2 = arith.constant 0 : index
    %6 = vector.load %arg0[%c0_1, %c0_2] : memref<8x128xf32, #tpu.memory_space<vmem>>, vector<8x128xf32>
    %c0_3 = arith.constant 0 : index
    %c0_4 = arith.constant 0 : index
    %c0_5 = arith.constant 0 : index
    %7 = vector.load %arg3[%c0_3, %c0_4, %c0_5] : memref<7x128x128xf32, #tpu.memory_space<vmem>>, vector<1x128x128xf32>
    %8 = vector.shape_cast %7 : vector<1x128x128xf32> to vector<128x128xf32>
    %cst = arith.constant dense<0.000000e+00> : vector<8x128xf32>
    %9 = tpu.matmul %6, %8, %cst {dimension_numbers = #tpu.dot_dimension_numbers<[1], [0], [0], [1], [0, 0, 1, 1], [], []>} : vector<8x128xf32>, vector<128x128xf32>, vector<8x128xf32> -> vector<8x128xf32>
    %c0_6 = arith.constant 0 : index
    %c0_7 = arith.constant 0 : index
    %10 = vector.load %arg2[%c0_6, %c0_7] : memref<8x128xf32, #tpu.memory_space<vmem>>, vector<8x128xf32>
    %cst_8 = arith.constant dense<0.000000e+00> : vector<8x128xf32>
    %11 = tpu.matmul %5, %10, %cst_8 {dimension_numbers = #tpu.dot_dimension_numbers<[1], [0], [0], [1], [0, 0, 1, 1], [], []>} : vector<8x8xf32>, vector<8x128xf32>, vector<8x128xf32> -> vector<8x128xf32>
    %12 = arith.addf %9, %11 : vector<8x128xf32>
    %c0_9 = arith.constant 0 : index
    %c0_10 = arith.constant 0 : index
    %c0_11 = arith.constant 0 : index
    %13 = vector.load %arg4[%c0_9, %c0_10, %c0_11] : memref<7x8x128xf32, #tpu.memory_space<vmem>>, vector<1x8x128xf32>
    %14 = vector.shape_cast %13 : vector<1x8x128xf32> to vector<8x128xf32>
    %15 = arith.addf %12, %14 : vector<8x128xf32>
    %16 = math.tanh %15 : vector<8x128xf32>
    %c1 = arith.constant 1 : index
    %c0_12 = arith.constant 0 : index
    %c0_13 = arith.constant 0 : index
    %17 = vector.load %arg3[%c1, %c0_12, %c0_13] : memref<7x128x128xf32, #tpu.memory_space<vmem>>, vector<1x128x128xf32>
    %18 = vector.shape_cast %17 : vector<1x128x128xf32> to vector<128x128xf32>
    %cst_14 = arith.constant dense<0.000000e+00> : vector<8x128xf32>
    %19 = tpu.matmul %16, %18, %cst_14 {dimension_numbers = #tpu.dot_dimension_numbers<[1], [0], [0], [1], [0, 0, 1, 1], [], []>} : vector<8x128xf32>, vector<128x128xf32>, vector<8x128xf32> -> vector<8x128xf32>
    %c1_15 = arith.constant 1 : index
    %c0_16 = arith.constant 0 : index
    %c0_17 = arith.constant 0 : index
    %20 = vector.load %arg4[%c1_15, %c0_16, %c0_17] : memref<7x8x128xf32, #tpu.memory_space<vmem>>, vector<1x8x128xf32>
    %21 = vector.shape_cast %20 : vector<1x8x128xf32> to vector<8x128xf32>
    %22 = arith.addf %19, %21 : vector<8x128xf32>
    %23 = math.tanh %22 : vector<8x128xf32>
    %c2 = arith.constant 2 : index
    %c0_18 = arith.constant 0 : index
    %c0_19 = arith.constant 0 : index
    %24 = vector.load %arg3[%c2, %c0_18, %c0_19] : memref<7x128x128xf32, #tpu.memory_space<vmem>>, vector<1x128x128xf32>
    %25 = vector.shape_cast %24 : vector<1x128x128xf32> to vector<128x128xf32>
    %cst_20 = arith.constant dense<0.000000e+00> : vector<8x128xf32>
    %26 = tpu.matmul %23, %25, %cst_20 {dimension_numbers = #tpu.dot_dimension_numbers<[1], [0], [0], [1], [0, 0, 1, 1], [], []>} : vector<8x128xf32>, vector<128x128xf32>, vector<8x128xf32> -> vector<8x128xf32>
    %c2_21 = arith.constant 2 : index
    %c0_22 = arith.constant 0 : index
    %c0_23 = arith.constant 0 : index
    %27 = vector.load %arg4[%c2_21, %c0_22, %c0_23] : memref<7x8x128xf32, #tpu.memory_space<vmem>>, vector<1x8x128xf32>
    %28 = vector.shape_cast %27 : vector<1x8x128xf32> to vector<8x128xf32>
    %29 = arith.addf %26, %28 : vector<8x128xf32>
    %30 = math.tanh %29 : vector<8x128xf32>
    %c3 = arith.constant 3 : index
    %c0_24 = arith.constant 0 : index
    %c0_25 = arith.constant 0 : index
    %31 = vector.load %arg3[%c3, %c0_24, %c0_25] : memref<7x128x128xf32, #tpu.memory_space<vmem>>, vector<1x128x128xf32>
    %32 = vector.shape_cast %31 : vector<1x128x128xf32> to vector<128x128xf32>
    %cst_26 = arith.constant dense<0.000000e+00> : vector<8x128xf32>
    %33 = tpu.matmul %30, %32, %cst_26 {dimension_numbers = #tpu.dot_dimension_numbers<[1], [0], [0], [1], [0, 0, 1, 1], [], []>} : vector<8x128xf32>, vector<128x128xf32>, vector<8x128xf32> -> vector<8x128xf32>
    %c3_27 = arith.constant 3 : index
    %c0_28 = arith.constant 0 : index
    %c0_29 = arith.constant 0 : index
    %34 = vector.load %arg4[%c3_27, %c0_28, %c0_29] : memref<7x8x128xf32, #tpu.memory_space<vmem>>, vector<1x8x128xf32>
    %35 = vector.shape_cast %34 : vector<1x8x128xf32> to vector<8x128xf32>
    %36 = arith.addf %33, %35 : vector<8x128xf32>
    %37 = math.tanh %36 : vector<8x128xf32>
    %c4 = arith.constant 4 : index
    %c0_30 = arith.constant 0 : index
    %c0_31 = arith.constant 0 : index
    %38 = vector.load %arg3[%c4, %c0_30, %c0_31] : memref<7x128x128xf32, #tpu.memory_space<vmem>>, vector<1x128x128xf32>
    %39 = vector.shape_cast %38 : vector<1x128x128xf32> to vector<128x128xf32>
    %cst_32 = arith.constant dense<0.000000e+00> : vector<8x128xf32>
    %40 = tpu.matmul %37, %39, %cst_32 {dimension_numbers = #tpu.dot_dimension_numbers<[1], [0], [0], [1], [0, 0, 1, 1], [], []>} : vector<8x128xf32>, vector<128x128xf32>, vector<8x128xf32> -> vector<8x128xf32>
    %c4_33 = arith.constant 4 : index
    %c0_34 = arith.constant 0 : index
    %c0_35 = arith.constant 0 : index
    %41 = vector.load %arg4[%c4_33, %c0_34, %c0_35] : memref<7x8x128xf32, #tpu.memory_space<vmem>>, vector<1x8x128xf32>
    %42 = vector.shape_cast %41 : vector<1x8x128xf32> to vector<8x128xf32>
    %43 = arith.addf %40, %42 : vector<8x128xf32>
    %44 = math.tanh %43 : vector<8x128xf32>
    %c5 = arith.constant 5 : index
    %c0_36 = arith.constant 0 : index
    %c0_37 = arith.constant 0 : index
    %45 = vector.load %arg3[%c5, %c0_36, %c0_37] : memref<7x128x128xf32, #tpu.memory_space<vmem>>, vector<1x128x128xf32>
    %46 = vector.shape_cast %45 : vector<1x128x128xf32> to vector<128x128xf32>
    %cst_38 = arith.constant dense<0.000000e+00> : vector<8x128xf32>
    %47 = tpu.matmul %44, %46, %cst_38 {dimension_numbers = #tpu.dot_dimension_numbers<[1], [0], [0], [1], [0, 0, 1, 1], [], []>} : vector<8x128xf32>, vector<128x128xf32>, vector<8x128xf32> -> vector<8x128xf32>
    %c5_39 = arith.constant 5 : index
    %c0_40 = arith.constant 0 : index
    %c0_41 = arith.constant 0 : index
    %48 = vector.load %arg4[%c5_39, %c0_40, %c0_41] : memref<7x8x128xf32, #tpu.memory_space<vmem>>, vector<1x8x128xf32>
    %49 = vector.shape_cast %48 : vector<1x8x128xf32> to vector<8x128xf32>
    %50 = arith.addf %47, %49 : vector<8x128xf32>
    %51 = math.tanh %50 : vector<8x128xf32>
    %c6 = arith.constant 6 : index
    %c0_42 = arith.constant 0 : index
    %c0_43 = arith.constant 0 : index
    %52 = vector.load %arg3[%c6, %c0_42, %c0_43] : memref<7x128x128xf32, #tpu.memory_space<vmem>>, vector<1x128x128xf32>
    %53 = vector.shape_cast %52 : vector<1x128x128xf32> to vector<128x128xf32>
    %cst_44 = arith.constant dense<0.000000e+00> : vector<8x128xf32>
    %54 = tpu.matmul %51, %53, %cst_44 {dimension_numbers = #tpu.dot_dimension_numbers<[1], [0], [0], [1], [0, 0, 1, 1], [], []>} : vector<8x128xf32>, vector<128x128xf32>, vector<8x128xf32> -> vector<8x128xf32>
    %c6_45 = arith.constant 6 : index
    %c0_46 = arith.constant 0 : index
    %c0_47 = arith.constant 0 : index
    %55 = vector.load %arg4[%c6_45, %c0_46, %c0_47] : memref<7x8x128xf32, #tpu.memory_space<vmem>>, vector<1x8x128xf32>
    %56 = vector.shape_cast %55 : vector<1x8x128xf32> to vector<8x128xf32>
    %57 = arith.addf %54, %56 : vector<8x128xf32>
    %c0_48 = arith.constant 0 : index
    %c0_49 = arith.constant 0 : index
    %58 = vector.load %arg5[%c0_48, %c0_49] : memref<8x128xf32, #tpu.memory_space<vmem>>, vector<8x128xf32>
    tpu.vector_store %arg5[%c0_48, %c0_49], %57 {strides = array<i32>} : memref<8x128xf32, #tpu.memory_space<vmem>>, vector<8x128xf32>,
    return
  }
}

</mosaic_0001>

<bundles_post_ra>
// kernel: embedded_custom_network.1
= control target key start
LH: loop header
LB: loop body
LE: loop exit
PB: predicated region body
PF: predicated region fallthrough
CT: control target
= control target key end

     0   :  { %10 = vsyncpa [#allocation3], 0  ;;  %s519_s0 = inlined_call_operand.vmem [shape: f32[8,128], index: 0, kind: input, shape index: {}]   ;;  %s520_s1 = inlined_call_operand.vmem [shape: s32[8,1], index: 1, kind: input, shape index: {}]   ;;  %s521_s2 = inlined_call_operand.vmem [shape: f32[8,128], index: 2, kind: input, shape index: {}]   ;;  %s522_s3 = inlined_call_operand.hbm [shape: f32[7,128,128], index: 3, kind: input, shape index: {}]   ;;  %s523_s4 = inlined_call_operand.vmem [shape: f32[7,8,128], index: 4, kind: input, shape index: {}]   ;;  %s524_s5 = inlined_call_operand.hbm [shape: f32[8,128], index: 5, kind: output, shape index: {}]  }
   0x1   :  { %11 = vsyncpa [#allocation4], 0  ;;  %s22_s20 = sshll.u32 %s522_s3, 4  ;;  %s447_s21 = smov [#allocation2]   ;;  %s23_s20 = int_to_ptr.hbm [resolvable:$true] %s22_s20 }
   0x2   :  { %s24_s22 = sshll.u32 %s447_s21, 4  ;;  %s448_s23 = smov 128   ;;  %s25_s22 = int_to_ptr.vmem [resolvable:$true] %s24_s22 }
   0x3   :  { %s449_s24 = smov 8  }
   0x4   :  { %30 = dma.hbm_to_vmem [thread:$0]  %s23_s20, 14336, %s25_s22, [#allocation3], %s448_s23, %s448_s23, %s449_s24  }
   0x5   :  { %443 = dma.done.wait [#allocation3], 14336  }
   0x6   :  { %444 = vsyncadd [#allocation3], 4294952960  ;;  %v450_v0 = vmov 0   ;;  %v37_v1 = vld [vmem:[%s520_s1] sm:$0xff]  ;;  %v62_v2 = vld [vmem:[#allocation2 + $0x78] sm:$0xff]  ;;  %v38_v30 = vlaneseq  ;;  %vm64_vm0 = vcmask 64512  }
   0x7   :  { %382 = vset.pattern.permute.xlu0 %v450_v0  ;;  %v61_v3 = vld [vmem:[#allocation2 + $0x70] sm:$0xff]  ;;  %88 = vmatpush.msra.mxu1 %v62_v2  ;;  %v60_v4 = vld [vmem:[#allocation2 + $0x68] sm:$0xff]  ;;  %v59_v5 = vld [vmem:[#allocation2 + $0x60] sm:$0xff]  ;;  %v451_v33 = vmov 0.0   ;;  %s452_s16 = smov [#allocation5]   ;;  %s358_s20 = sshll.u32 %s524_s5, 4  ;;  %s359_s20 = int_to_ptr.hbm [resolvable:$true] %s358_s20 }
   0x8   :  { %41 = vperm.xlu0 %382, %v37_v1   ;;  %v58_v6 = vld [vmem:[#allocation2 + $0x58] sm:$0xff]  ;;  %v57_v7 = vld [vmem:[#allocation2 + $0x50] sm:$0xff]  ;;  %v56_v8 = vld [vmem:[#allocation2 + $0x48] sm:$0xff]  ;;  %v39_v31 = vand.u32 127, %v38_v30  ;;  %s356_s17 = sshll.u32 %s452_s16, 4  ;;  %s357_s17 = int_to_ptr.vmem [resolvable:$true] %s356_s17 }
   0x9   :  { %89 = vmatpush.msra.mxu1 %v61_v3  ;;  %v55_v9 = vld [vmem:[#allocation2 + $0x40] sm:$0xff]  ;;  %v54_v10 = vld [vmem:[#allocation2 + $0x38] sm:$0xff]  ;;  %v53_v11 = vld [vmem:[#allocation2 + $0x30] sm:$0xff] }
   0xa   :  { %v52_v12 = vld [vmem:[#allocation2 + $0x28] sm:$0xff]  ;;  %v51_v13 = vld [vmem:[#allocation2 + $0x20] sm:$0xff]  ;;  %v50_v14 = vld [vmem:[#allocation2 + $0x18] sm:$0xff] }
   0xb   :  { %90 = vmatpush.msra.mxu1 %v60_v4  ;;  %v49_v15 = vld [vmem:[#allocation2 + $0x10] sm:$0xff]  ;;  %v48_v16 = vld [vmem:[#allocation2 + $0x8] sm:$0xff]  ;;  %v63_v17 = vld [vmem:[%s521_s2] sm:$0xff] }
   0xc   :  { %v47_v18 = vld [vmem:[#allocation2] sm:$0xff]  ;;  %83 = vmatpush.msra.mxu0 %v63_v17  ;;  %v127_v20 = vld [vmem:[#allocation2 + $0xf8] sm:$0xff]  ;;  %v126_v21 = vld [vmem:[#allocation2 + $0xf0] sm:$0xff] }
   0xd   :  { %91 = vmatpush.msra.mxu1 %v59_v5  ;;  %v46_v19 = vld [vmem:[%s519_s0] sm:$0xff]  ;;  %130 = vmatpush.msra.mxu2 %v127_v20  ;;  %v125_v22 = vld [vmem:[#allocation2 + $0xe8] sm:$0xff]  ;;  %v123_v24 = vld [vmem:[#allocation2 + $0xd8] sm:$0xff] }
   0xe   :  { %v124_v23 = vld [vmem:[#allocation2 + $0xe0] sm:$0xff]  ;;  %v122_v25 = vld [vmem:[#allocation2 + $0xd0] sm:$0xff]  ;;  %v121_v26 = vld [vmem:[#allocation2 + $0xc8] sm:$0xff] }
   0xf   :  { %92 = vmatpush.msra.mxu1 %v58_v6  ;;  %131 = vmatpush.msra.mxu2 %v126_v21  ;;  %v120_v27 = vld [vmem:[#allocation2 + $0xc0] sm:$0xff]  ;;  %v119_v28 = vld [vmem:[#allocation2 + $0xb8] sm:$0xff]  ;;  %v118_v29 = vld [vmem:[#allocation2 + $0xb0] sm:$0xff] }
  0x10   :  { %v117_v35 = vld [vmem:[#allocation2 + $0xa8] sm:$0xff]  ;;  %v116_v36 = vld [vmem:[#allocation2 + $0xa0] sm:$0xff]  ;;  %v115_v37 = vld [vmem:[#allocation2 + $0x98] sm:$0xff] }
  0x11   :  { %93 = vmatpush.msra.mxu1 %v57_v7  ;;  %132 = vmatpush.msra.mxu2 %v125_v22  ;;  %v114_v38 = vld [vmem:[#allocation2 + $0x90] sm:$0xff]  ;;  %v113_v39 = vld [vmem:[#allocation2 + $0x88] sm:$0xff]  ;;  %v112_v40 = vld [vmem:[#allocation2 + $0x80] sm:$0xff] }
  0x12   :  { %v167_v41 = vld [vmem:[#allocation2 + $0x178] sm:$0xff]  ;;  %v166_v42 = vld [vmem:[#allocation2 + $0x170] sm:$0xff]  ;;  %v165_v43 = vld [vmem:[#allocation2 + $0x168] sm:$0xff] }
  0x13   :  { %94 = vmatpush.msra.mxu1 %v56_v8  ;;  %133 = vmatpush.msra.mxu2 %v124_v23  ;;  %v164_v44 = vld [vmem:[#allocation2 + $0x160] sm:$0xff]  ;;  %v163_v45 = vld [vmem:[#allocation2 + $0x158] sm:$0xff]  ;;  %v162_v46 = vld [vmem:[#allocation2 + $0x150] sm:$0xff] }
  0x14   :  { %170 = vmatpush.msra.mxu3 %v167_v41  ;;  %v161_v47 = vld [vmem:[#allocation2 + $0x148] sm:$0xff]  ;;  %v160_v48 = vld [vmem:[#allocation2 + $0x140] sm:$0xff]  ;;  %v159_v49 = vld [vmem:[#allocation2 + $0x138] sm:$0xff] }
  0x15   :  { %95 = vmatpush.msra.mxu1 %v55_v9  ;;  %134 = vmatpush.msra.mxu2 %v123_v24  ;;  %v158_v50 = vld [vmem:[#allocation2 + $0x130] sm:$0xff]  ;;  %v157_v52 = vld [vmem:[#allocation2 + $0x128] sm:$0xff]  ;;  %v108_v54 = vld [vmem:[%s523_s4] sm:$0xff] }
  0x16   :  { %171 = vmatpush.msra.mxu3 %v166_v42  ;;  %v156_v58 = vld [vmem:[#allocation2 + $0x120] sm:$0xff]  ;;  %v155_v59 = vld [vmem:[#allocation2 + $0x118] sm:$0xff]  ;;  %v154_v60 = vld [vmem:[#allocation2 + $0x110] sm:$0xff] }
  0x17   :  { %96 = vmatpush.msra.mxu1 %v54_v10  ;;  %135 = vmatpush.msra.mxu2 %v122_v25  ;;  %v153_v61 = vld [vmem:[#allocation2 + $0x108] sm:$0xff]  ;;  %v152_v62 = vld [vmem:[#allocation2 + $0x100] sm:$0xff]  ;;  %v207_v63 = vld [vmem:[#allocation2 + $0x1f8] sm:$0xff] }
  0x18   :  { %172 = vmatpush.msra.mxu3 %v165_v43  ;;  %v206_v0 = vld [vmem:[#allocation2 + $0x1f0] sm:$0xff]  ;;  %210 = vmatpush.msrb.mxu0 %v207_v63  ;;  %v205_v1 = vld [vmem:[#allocation2 + $0x1e8] sm:$0xff]  ;;  %v204_v2 = vld [vmem:[#allocation2 + $0x1e0] sm:$0xff] }
  0x19   :  { %97 = vmatpush.msra.mxu1 %v53_v11  ;;  %136 = vmatpush.msra.mxu2 %v121_v26  ;;  %v203_v3 = vld [vmem:[#allocation2 + $0x1d8] sm:$0xff]  ;;  %v202_v4 = vld [vmem:[#allocation2 + $0x1d0] sm:$0xff]  ;;  %v201_v5 = vld [vmem:[#allocation2 + $0x1c8] sm:$0xff] }
  0x1a   :  { %173 = vmatpush.msra.mxu3 %v164_v44  ;;  %211 = vmatpush.msrb.mxu0 %v206_v0  ;;  %v200_v6 = vld [vmem:[#allocation2 + $0x1c0] sm:$0xff]  ;;  %v199_v7 = vld [vmem:[#allocation2 + $0x1b8] sm:$0xff]  ;;  %v198_v8 = vld [vmem:[#allocation2 + $0x1b0] sm:$0xff] }
  0x1b   :  { %98 = vmatpush.msra.mxu1 %v52_v12  ;;  %137 = vmatpush.msra.mxu2 %v120_v27  ;;  %v197_v9 = vld [vmem:[#allocation2 + $0x1a8] sm:$0xff]  ;;  %v246_v20 = vld [vmem:[#allocation2 + $0x270] sm:$0xff]  ;;  %v244_v22 = vld [vmem:[#allocation2 + $0x260] sm:$0xff] }
  0x1c   :  { %174 = vmatpush.msra.mxu3 %v163_v45  ;;  %212 = vmatpush.msrb.mxu0 %v205_v1  ;;  %v370_v10 = vld [vmem:[%s523_s4 + $0x8] sm:$0xff]  ;;  %v243_v23 = vld [vmem:[#allocation2 + $0x258] sm:$0xff]  ;;  %v242_v24 = vld [vmem:[#allocation2 + $0x250] sm:$0xff] }
  0x1d   :  { %99 = vmatpush.msra.mxu1 %v51_v13  ;;  %138 = vmatpush.msra.mxu2 %v119_v28  ;;  %v193_v17 = vld [vmem:[#allocation2 + $0x188] sm:$0xff]  ;;  %v240_v26 = vld [vmem:[#allocation2 + $0x240] sm:$0xff]  ;;  %v239_v27 = vld [vmem:[#allocation2 + $0x238] sm:$0xff] }
  0x1e   :  { %175 = vmatpush.msra.mxu3 %v162_v46  ;;  %213 = vmatpush.msrb.mxu0 %v204_v2  ;;  %v245_v21 = vld [vmem:[#allocation2 + $0x268] sm:$0xff]  ;;  %v238_v28 = vld [vmem:[#allocation2 + $0x230] sm:$0xff]  ;;  %v284_v42 = vld [vmem:[#allocation2 + $0x2e0] sm:$0xff] }
  0x1f   :  { %100 = vmatpush.msra.mxu1 %v50_v14  ;;  %139 = vmatpush.msra.mxu2 %v118_v29  ;;  %v196_v14 = vld [vmem:[#allocation2 + $0x1a0] sm:$0xff]  ;;  %v241_v25 = vld [vmem:[#allocation2 + $0x248] sm:$0xff]  ;;  %v371_v30 = vld [vmem:[%s523_s4 + $0x10] sm:$0xff] }
  0x20   :  { %176 = vmatpush.msra.mxu3 %v161_v47  ;;  %214 = vmatpush.msrb.mxu0 %v203_v3  ;;  %v237_v29 = vld [vmem:[#allocation2 + $0x228] sm:$0xff]  ;;  %v283_v43 = vld [vmem:[#allocation2 + $0x2d8] sm:$0xff]  ;;  %v282_v44 = vld [vmem:[#allocation2 + $0x2d0] sm:$0xff] }
  0x21   :  { %101 = vmatpush.msra.mxu1 %v49_v15  ;;  %140 = vmatpush.msra.mxu2 %v117_v35  ;;  %v195_v15 = vld [vmem:[#allocation2 + $0x198] sm:$0xff]  ;;  %v285_v41 = vld [vmem:[#allocation2 + $0x2e8] sm:$0xff]  ;;  %v280_v46 = vld [vmem:[#allocation2 + $0x2c0] sm:$0xff] }
  0x22   :  { %177 = vmatpush.msra.mxu3 %v160_v48  ;;  %215 = vmatpush.msrb.mxu0 %v202_v4  ;;  %v235_v35 = vld [vmem:[#allocation2 + $0x218] sm:$0xff]  ;;  %v281_v45 = vld [vmem:[#allocation2 + $0x2c8] sm:$0xff]  ;;  %v278_v48 = vld [vmem:[#allocation2 + $0x2b0] sm:$0xff] }
  0x23   :  { %102 = vmatpush.msra.mxu1 %v48_v16  ;;  %141 = vmatpush.msra.mxu2 %v116_v36  ;;  %v194_v16 = vld [vmem:[#allocation2 + $0x190] sm:$0xff]  ;;  %v279_v47 = vld [vmem:[#allocation2 + $0x2b8] sm:$0xff]  ;;  %v321_v1 = vld [vmem:[#allocation2 + $0x348] sm:$0xff] }
  0x24   :  { %178 = vmatpush.msra.mxu3 %v159_v49  ;;  %216 = vmatpush.msrb.mxu0 %v201_v5  ;;  %v234_v36 = vld [vmem:[#allocation2 + $0x210] sm:$0xff]  ;;  %v277_v49 = vld [vmem:[#allocation2 + $0x2a8] sm:$0xff]  ;;  %v323_v63 = vld [vmem:[#allocation2 + $0x358] sm:$0xff] }
  0x25   :  { %103 = vmatpush.msra.mxu1 %v47_v18  ;;  %142 = vmatpush.msra.mxu2 %v115_v37  ;;  %v192_v18 = vld [vmem:[#allocation2 + $0x180] sm:$0xff]  ;;  %v233_v37 = vld [vmem:[#allocation2 + $0x208] sm:$0xff]  ;;  %v322_v0 = vld [vmem:[#allocation2 + $0x350] sm:$0xff] }
  0x26   :  { %104 = vmatmul.f32.vlgmr.msra.gmra.mxu1 %v46_v19  ;;  %179 = vmatpush.msra.mxu3 %v158_v50  ;;  %v247_v19 = vld [vmem:[#allocation2 + $0x278] sm:$0xff]  ;;  %v320_v2 = vld [vmem:[#allocation2 + $0x340] sm:$0xff]  ;;  %v318_v4 = vld [vmem:[#allocation2 + $0x330] sm:$0xff] }
  0x27   :  { %143 = vmatpush.msra.mxu2 %v114_v38  ;;  %217 = vmatpush.msrb.mxu0 %v200_v6  ;;  %v232_v38 = vld [vmem:[#allocation2 + $0x200] sm:$0xff]  ;;  %v372_v50 = vld [vmem:[%s523_s4 + $0x18] sm:$0xff]  ;;  %v317_v5 = vld [vmem:[#allocation2 + $0x328] sm:$0xff] }
  0x28   :  { %180 = vmatpush.msra.mxu3 %v157_v52  ;;  %250 = vmatpush.msrb.mxu1 %v247_v19  ;;  %v319_v3 = vld [vmem:[#allocation2 + $0x338] sm:$0xff]  ;;  %v373_v6 = vld [vmem:[%s523_s4 + $0x20] sm:$0xff]  ;;  %v375_v19 = vld [vmem:[%s523_s4 + $0x30] sm:$0xff] }
  0x29   :  { %144 = vmatpush.msra.mxu2 %v113_v39  ;;  %218 = vmatpush.msrb.mxu0 %v199_v7  ;;  %v287_v39 = vld [vmem:[#allocation2 + $0x2f8] sm:$0xff] }
  0x2a   :  { %181 = vmatpush.msra.mxu3 %v156_v58  ;;  %251 = vmatpush.msrb.mxu1 %v246_v20  ;;  %v272_v58 = vld [vmem:[#allocation2 + $0x280] sm:$0xff] }
  0x2b   :  { %145 = vmatpush.msra.mxu2 %v112_v40  ;;  %219 = vmatpush.msrb.mxu0 %v198_v8  ;;  %v286_v40 = vld [vmem:[#allocation2 + $0x2f0] sm:$0xff] }
  0x2c   :  { %182 = vmatpush.msra.mxu3 %v155_v59  ;;  %252 = vmatpush.msrb.mxu1 %v245_v21  ;;  %v327_v59 = vld [vmem:[#allocation2 + $0x378] sm:$0xff] }
  0x2d   :  { %220 = vmatpush.msrb.mxu0 %v197_v9  ;;  %290 = vmatpush.msrb.mxu2 %v287_v39 }
  0x2e   :  { %183 = vmatpush.msra.mxu3 %v154_v60  ;;  %253 = vmatpush.msrb.mxu1 %v244_v22  ;;  %v326_v60 = vld [vmem:[#allocation2 + $0x370] sm:$0xff] }
  0x2f   :  { %221 = vmatpush.msrb.mxu0 %v196_v14  ;;  %291 = vmatpush.msrb.mxu2 %v286_v40  ;;  %v312_v14 = vld [vmem:[#allocation2 + $0x300] sm:$0xff] }
  0x30   :  { %184 = vmatpush.msra.mxu3 %v153_v61  ;;  %254 = vmatpush.msrb.mxu1 %v243_v23  ;;  %v325_v61 = vld [vmem:[#allocation2 + $0x368] sm:$0xff] }
  0x31   :  { %222 = vmatpush.msrb.mxu0 %v195_v15  ;;  %292 = vmatpush.msrb.mxu2 %v285_v41  ;;  %v374_v15 = vld [vmem:[%s523_s4 + $0x28] sm:$0xff] }
  0x32   :  { %185 = vmatpush.msra.mxu3 %v152_v62  ;;  %255 = vmatpush.msrb.mxu1 %v242_v24  ;;  %v324_v62 = vld [vmem:[#allocation2 + $0x360] sm:$0xff] }
  0x33   :  { %223 = vmatpush.msrb.mxu0 %v194_v16  ;;  %293 = vmatpush.msrb.mxu2 %v284_v42 }
  0x34   :  { %256 = vmatpush.msrb.mxu1 %v241_v25  ;;  %330 = vmatpush.msrb.mxu3 %v327_v59 }
  0x35   :  { %224 = vmatpush.msrb.mxu0 %v193_v17  ;;  %294 = vmatpush.msrb.mxu2 %v283_v43 }
  0x36   :  { %257 = vmatpush.msrb.mxu1 %v240_v26  ;;  %331 = vmatpush.msrb.mxu3 %v326_v60 }
  0x37   :  { %225 = vmatpush.msrb.mxu0 %v192_v18  ;;  %295 = vmatpush.msrb.mxu2 %v282_v44 }
  0x38   :  { %258 = vmatpush.msrb.mxu1 %v239_v27  ;;  %332 = vmatpush.msrb.mxu3 %v325_v61 }
  0x39   :  { %296 = vmatpush.msrb.mxu2 %v281_v45 }
  0x3a   :  { %259 = vmatpush.msrb.mxu1 %v238_v28  ;;  %333 = vmatpush.msrb.mxu3 %v324_v62 }
  0x3b   :  { %297 = vmatpush.msrb.mxu2 %v280_v46 }
  0x3c   :  { %260 = vmatpush.msrb.mxu1 %v237_v29  ;;  %334 = vmatpush.msrb.mxu3 %v323_v63 }
  0x3d   :  { %298 = vmatpush.msrb.mxu2 %v279_v47 }
  0x3e   :  { %335 = vmatpush.msrb.mxu3 %v322_v0 }
  0x3f   :  { %299 = vmatpush.msrb.mxu2 %v278_v48 }
  0x40   :  { %336 = vmatpush.msrb.mxu3 %v321_v1 }
  0x41   :  { %300 = vmatpush.msrb.mxu2 %v277_v49 }
  0x42   :  { %337 = vmatpush.msrb.mxu3 %v320_v2 }
  0x44   :  { %338 = vmatpush.msrb.mxu3 %v319_v3 }
  0x46   :  { %339 = vmatpush.msrb.mxu3 %v318_v4 }
  0x48   :  { %340 = vmatpush.msrb.mxu3 %v317_v5 }
  0x7a   :  { %v42_v32 = vpop.permute.xlu0 %41 }
  0x7b   :  { %vm43_vm1 = vcmp.eq.s32.totalorder %v39_v31, %v42_v32 }
  0x7c   :  { %v368_v34 = vsel %vm43_vm1, 1.0, %v451_v33 }
  0x7d   :  { %369 = vmatmul.msk.f32.vlgmr.msra.gmra.mxu0 %vm64_vm0, %v368_v34  ;;  %v236_v34 = vld [vmem:[#allocation2 + $0x220] sm:$0xff] }
  0x7e   :  { %261 = vmatpush.msrb.mxu1 %v236_v34 }
  0x80   :  { %262 = vmatpush.msrb.mxu1 %v235_v35 }
  0x82   :  { %263 = vmatpush.msrb.mxu1 %v234_v36 }
  0x84   :  { %264 = vmatpush.msrb.mxu1 %v233_v37 }
  0x86   :  { %265 = vmatpush.msrb.mxu1 %v232_v38 }
  0xa3   :  { %v105_v51 = vpop.f32.mrf.mxu1 }
  0xfa   :  { %v85_v53 = vpop.f32.mrf.mxu0 }
  0xfb   :  { %v106_v55 = vadd.f32 %v105_v51, %v85_v53 }
  0xfd   :  { %v109_v56 = vadd.f32 %v108_v54, %v106_v55  ;;  %v276_v54 = vld [vmem:[#allocation2 + $0x2a0] sm:$0xff]  ;;  %v275_v55 = vld [vmem:[#allocation2 + $0x298] sm:$0xff] }
  0xfe   :  { %301 = vmatpush.msrb.mxu2 %v276_v54 }
  0xff   :  { %383 = vtanh.f32 %v109_v56  ;;  %v274_v56 = vld [vmem:[#allocation2 + $0x290] sm:$0xff] }
 0x100   :  { %302 = vmatpush.msrb.mxu2 %v275_v55 }
 0x102   :  { %303 = vmatpush.msrb.mxu2 %v274_v56 }
 0x105   :  { %v384_v57 = vpop.eup %383 }
 0x106   :  { %146 = vmatmul.f32.vlgmr.msra.gmra.mxu2 %v384_v57  ;;  %v273_v57 = vld [vmem:[#allocation2 + $0x288] sm:$0xff] }
 0x107   :  { %304 = vmatpush.msrb.mxu2 %v273_v57 }
 0x109   :  { %305 = vmatpush.msrb.mxu2 %v272_v58 }
 0x189   :  { %v147_v11 = vpop.f32.mrf.mxu2 }
 0x18a   :  { %v148_v12 = vadd.f32 %v370_v10, %v147_v11  ;;  %v316_v10 = vld [vmem:[#allocation2 + $0x320] sm:$0xff]  ;;  %v315_v11 = vld [vmem:[#allocation2 + $0x318] sm:$0xff] }
 0x18b   :  { %341 = vmatpush.msrb.mxu3 %v316_v10 }
 0x18c   :  { %385 = vtanh.f32 %v148_v12  ;;  %v314_v12 = vld [vmem:[#allocation2 + $0x310] sm:$0xff] }
 0x18d   :  { %342 = vmatpush.msrb.mxu3 %v315_v11 }
 0x18f   :  { %343 = vmatpush.msrb.mxu3 %v314_v12 }
 0x192   :  { %v386_v13 = vpop.eup %385 }
 0x193   :  { %186 = vmatmul.f32.vlgmr.msra.gmra.mxu3 %v386_v13  ;;  %v313_v13 = vld [vmem:[#allocation2 + $0x308] sm:$0xff] }
 0x194   :  { %344 = vmatpush.msrb.mxu3 %v313_v13 }
 0x196   :  { %345 = vmatpush.msrb.mxu3 %v312_v14 }
 0x216   :  { %v187_v31 = vpop.f32.mrf.mxu3 }
 0x217   :  { %v188_v32 = vadd.f32 %v371_v30, %v187_v31 }
 0x219   :  { %387 = vtanh.f32 %v188_v32 }
 0x21f   :  { %v388_v33 = vpop.eup %387 }
 0x220   :  { %226 = vmatmul.f32.vlgmr.msrb.gmra.mxu0 %v388_v33 }
 0x29d   :  { %v227_v51 = vpop.f32.mrf.mxu0 }
 0x29e   :  { %v228_v52 = vadd.f32 %v372_v50, %v227_v51 }
 0x2a0   :  { %389 = vtanh.f32 %v228_v52 }
 0x2a6   :  { %v390_v53 = vpop.eup %389 }
 0x2a7   :  { %266 = vmatmul.f32.vlgmr.msrb.gmra.mxu1 %v390_v53 }
 0x324   :  { %v267_v7 = vpop.f32.mrf.mxu1 }
 0x325   :  { %v268_v8 = vadd.f32 %v373_v6, %v267_v7 }
 0x327   :  { %391 = vtanh.f32 %v268_v8 }
 0x32d   :  { %v392_v9 = vpop.eup %391 }
 0x32e   :  { %306 = vmatmul.f32.vlgmr.msrb.gmra.mxu2 %v392_v9 }
 0x3b1   :  { %v307_v16 = vpop.f32.mrf.mxu2 }
 0x3b2   :  { %v308_v17 = vadd.f32 %v374_v15, %v307_v16 }
 0x3b4   :  { %393 = vtanh.f32 %v308_v17 }
 0x3ba   :  { %v394_v18 = vpop.eup %393 }
 0x3bb   :  { %346 = vmatmul.f32.vlgmr.msrb.gmra.mxu3 %v394_v18 }
 0x43e   :  { %v347_v20 = vpop.f32.mrf.mxu3 }
 0x43f   :  { %v348_v21 = vadd.f32 %v375_v19, %v347_v20 }
 0x441   :  { %350 = vst [vmem:[#allocation5] sm:$0xff] %v348_v21 }
 0x442   :  { %361 = dma.vmem_to_hbm [thread:$0]  %s357_s17, 128, %s359_s20, [#allocation4]  }
 0x443   :  { %445 = dma.done.wait [#allocation4], 128  }
 0x444   :  { %446 = vsyncadd [#allocation4], 4294967168 }
 0x445   :  { %366 = vsyncpa [#allocation3], 1 }
 0x446   :  { %367 = vsyncpa [#allocation4], 1 }

</bundles_post_ra>
